<compile_context>
chip_gen: v6e
topology: v6e:2x2x1
jax: 0.10.0
libtpu: 0.0.40
codegen_flags: <defaults>
</compile_context>

<pallas_src>
import functools

import jax
import jax.numpy as jnp
import numpy as np
from jax.experimental import pallas as pl
from jax.experimental.pallas import tpu as pltpu


def simam_conv3d_kernel(p_ref, w_ref, b_ref, o_ref, *, dhw, e_lambda):
    """One batch element: conv-as-matmul + bias + ReLU + SimAM, lane-dense (Cout, DHW)."""
    # Conv3d hot path: (Cout, KC) @ (KC, DHW) on the MXU, bf16 in / f32 accumulate.
    conv = jnp.dot(w_ref[...], p_ref[...], preferred_element_type=jnp.float32)
    x = jnp.maximum(conv + b_ref[...], 0.0)                # bias + ReLU, (Cout, DHW) f32

    # SimAM: fused single-pass per-channel spatial statistics (lane reductions).
    sum_x = jnp.sum(x, axis=-1, keepdims=True)             # (Cout, 1)
    sum_xx = jnp.sum(x * x, axis=-1, keepdims=True)        # (Cout, 1)
    mu = sum_x * (1.0 / dhw)                                # (Cout, 1)
    s = sum_xx - sum_x * mu                                 # = sum((x - mu)^2), (Cout, 1)

    xm2 = (x - mu) ** 2                                     # (Cout, DHW)
    # Tiny per-channel reciprocal on the EUP instead of a full (Cout x DHW) divide.
    inv_den = pl.reciprocal(4.0 * (s * (1.0 / (dhw - 1.0)) + e_lambda), approx=True)
    y = xm2 * inv_den + 0.5
    o_ref[...] = (x * jax.nn.sigmoid(y)).astype(o_ref.dtype)


def simam_conv3d(x_ncdhw, weight_oidhw, bias, *, padding=1, e_lambda=1e-4):
    B, Cin, D, H, W = x_ncdhw.shape
    Cout, Cin_w, Kd, Kh, Kw = weight_oidhw.shape
    assert Cin == Cin_w and Kd == Kh == Kw, "square kernel expected"
    K = Kd
    Do = D + 2 * padding - K + 1
    Ho = H + 2 * padding - K + 1
    Wo = W + 2 * padding - K + 1
    DHW = Do * Ho * Wo
    KC = Cin * K * K * K

    # --- glue: zero-pad NCDHW, transposed im2col -> (B, Cin*K^3, DHW), bf16 ---
    xp = jnp.pad(
        x_ncdhw.astype(jnp.float32),
        ((0, 0), (0, 0), (padding, padding), (padding, padding), (padding, padding)),
    )
    cols = [
        xp[:, :, kd:kd + Do, kh:kh + Ho, kw:kw + Wo]        # each (B, Cin, Do, Ho, Wo)
        for kd in range(K) for kh in range(K) for kw in range(K)
    ]
    # Stack kernel offsets after Cin so the flattened contraction order is
    # (ci, kd, kh, kw) -- exactly the order of a plain reshape of the OIDHW weight.
    patches = (
        jnp.stack(cols, axis=2)                             # (B, Cin, K^3, Do, Ho, Wo)
        .reshape(B, KC, DHW)
        .astype(jnp.bfloat16)
    )
    w2 = weight_oidhw.reshape(Cout, KC).astype(jnp.bfloat16)
    b2 = bias.reshape(Cout, 1).astype(jnp.float32)

    kern = functools.partial(
        simam_conv3d_kernel, dhw=float(DHW), e_lambda=float(e_lambda)
    )

    out = pl.pallas_call(
        kern,
        out_shape=jax.ShapeDtypeStruct((B, Cout, DHW), jnp.float32),
        grid_spec=pltpu.PrefetchScalarGridSpec(
            num_scalar_prefetch=0,
            grid=(B,),
            in_specs=[
                pl.BlockSpec((None, KC, DHW), lambda b: (b, 0, 0)),  # per-batch patches
                pl.BlockSpec((Cout, KC), lambda b: (0, 0)),          # shared weight
                pl.BlockSpec((Cout, 1), lambda b: (0, 0)),           # shared bias
            ],
            out_specs=pl.BlockSpec((None, Cout, DHW), lambda b: (b, 0, 0)),
        ),
        compiler_params=pltpu.CompilerParams(dimension_semantics=("parallel",)),
    )(patches, w2, b2)

    # --- glue: (B, Cout, DHW) -> NCDHW (pure reshape, Cout already leading) ---
    return out.reshape(B, Cout, Do, Ho, Wo)


def reference(x_ncdhw, weight_oidhw, bias, *, padding=1, e_lambda=1e-4):
    """Pure-JAX f32 reference mirroring the PyTorch forward."""
    conv = jax.lax.conv_general_dilated(
        x_ncdhw.astype(jnp.float32), weight_oidhw.astype(jnp.float32),
        window_strides=(1, 1, 1),
        padding=[(padding, padding)] * 3,
        dimension_numbers=("NCDHW", "OIDHW", "NCDHW"),
        precision=jax.lax.Precision.HIGHEST,
    )
    conv = conv + bias.reshape(1, -1, 1, 1, 1)
    xr = jnp.maximum(conv, 0.0)
    _, _, d, h, w = xr.shape
    n = d * h * w - 1
    mu = xr.mean(axis=(2, 3, 4), keepdims=True)
    xm2 = (xr - mu) ** 2
    y = xm2 / (4.0 * (xm2.sum(axis=(2, 3, 4), keepdims=True) / n + e_lambda)) + 0.5
    return xr * jax.nn.sigmoid(y)


if __name__ == "__main__":
    # Small shapes consistent with the module: B=2, Cin=4, Cout=8, D=H=W=8, K=3.
    B, Cin, Cout, D, H, W, K = 2, 4, 8, 8, 8, 8, 3
    e_lambda = 1e-4

    key = jax.random.PRNGKey(0)
    kx, kw, kb = jax.random.split(key, 3)

    x = jax.random.normal(kx, (B, Cin, D, H, W), dtype=jnp.float32)

    # Deterministic PyTorch-like init: U(-k, k) with k = 1/sqrt(Cin * K^3).
    fan_in = Cin * K * K * K
    bound = 1.0 / np.sqrt(fan_in)
    weight = jax.random.uniform(kw, (Cout, Cin, K, K, K), jnp.float32, -bound, bound)
    bias = jax.random.uniform(kb, (Cout,), jnp.float32, -bound, bound)

    out = simam_conv3d(x, weight, bias, padding=1, e_lambda=e_lambda)
    out = jax.block_until_ready(out)

    ref = jax.block_until_ready(reference(x, weight, bias, padding=1, e_lambda=e_lambda))

    assert out.shape == (B, Cout, D, H, W), out.shape
    # bf16 matmul inputs (f32 accumulation) vs f32 HIGHEST reference -> relax tolerance.
    np.testing.assert_allclose(np.asarray(out), np.asarray(ref), rtol=2e-2, atol=2e-2)

    print("KERNEL_OK")
</pallas_src>

<mosaic_0001>
module attributes {stable_mosaic.version = 11 : i64} {
  func.func @simam_conv3d_kernel(%arg0: i32, %arg1: memref<1x108x512xbf16, #tpu.memory_space<vmem>>, %arg2: memref<8x108xbf16, #tpu.memory_space<vmem>>, %arg3: memref<8x1xf32, #tpu.memory_space<vmem>>, %arg4: memref<1x8x512xf32, #tpu.memory_space<vmem>>) attributes {dimension_semantics = [#tpu.dimension_semantics<parallel>], iteration_bounds = array<i64: 2>, scalar_prefetch = 0 : i64, scratch_operands = 0 : i64, tpu.core_type = #tpu.core_type<tc>, window_params = [{transform_indices = @transform_0, window_bounds = array<i64: 1, 108, 512>}, {pipeline_mode = #tpu.pipeline_mode<synchronous>, transform_indices = @transform_1, window_bounds = array<i64: 8, 108>}, {pipeline_mode = #tpu.pipeline_mode<synchronous>, transform_indices = @transform_2, window_bounds = array<i64: 8, 1>}, {transform_indices = @transform_3, window_bounds = array<i64: 1, 8, 512>}]} {
    %c0 = arith.constant 0 : index
    %c0_0 = arith.constant 0 : index
    %0 = vector.load %arg2[%c0, %c0_0] : memref<8x108xbf16, #tpu.memory_space<vmem>>, vector<8x108xbf16>
    %c0_1 = arith.constant 0 : index
    %c0_2 = arith.constant 0 : index
    %c0_3 = arith.constant 0 : index
    %1 = vector.load %arg1[%c0_1, %c0_2, %c0_3] : memref<1x108x512xbf16, #tpu.memory_space<vmem>>, vector<1x108x512xbf16>
    %2 = vector.shape_cast %1 : vector<1x108x512xbf16> to vector<108x512xbf16>
    %cst = arith.constant dense<0.000000e+00> : vector<8x512xf32>
    %3 = tpu.matmul %0, %2, %cst {dimension_numbers = #tpu.dot_dimension_numbers<[1], [0], [0], [1], [0, 0, 1, 1], [], []>} : vector<8x108xbf16>, vector<108x512xbf16>, vector<8x512xf32> -> vector<8x512xf32>
    %c0_4 = arith.constant 0 : index
    %c0_5 = arith.constant 0 : index
    %4 = vector.load %arg3[%c0_4, %c0_5] : memref<8x1xf32, #tpu.memory_space<vmem>>, vector<8x1xf32>
    %5 = vector.broadcast %4 : vector<8x1xf32> to vector<8x512xf32>
    %6 = arith.addf %3, %5 : vector<8x512xf32>
    %cst_6 = arith.constant 0.000000e+00 : f32
    %7 = vector.broadcast %cst_6 : f32 to vector<8x512xf32>
    %8 = arith.maximumf %6, %7 : vector<8x512xf32>
    %cst_7 = arith.constant dense<0.000000e+00> : vector<8xf32>
    %9 = vector.multi_reduction <add>, %8, %cst_7 [1] : vector<8x512xf32> to vector<8xf32>
    %10 = vector.shape_cast %9 : vector<8xf32> to vector<8x1xf32>
    %11 = arith.mulf %8, %8 : vector<8x512xf32>
    %cst_8 = arith.constant dense<0.000000e+00> : vector<8xf32>
    %12 = vector.multi_reduction <add>, %11, %cst_8 [1] : vector<8x512xf32> to vector<8xf32>
    %13 = vector.shape_cast %12 : vector<8xf32> to vector<8x1xf32>
    %cst_9 = arith.constant 0.001953125 : f32
    %14 = vector.broadcast %cst_9 : f32 to vector<8x1xf32>
    %15 = arith.mulf %10, %14 : vector<8x1xf32>
    %16 = arith.mulf %10, %15 : vector<8x1xf32>
    %17 = arith.subf %13, %16 : vector<8x1xf32>
    %18 = vector.broadcast %15 : vector<8x1xf32> to vector<8x512xf32>
    %19 = arith.subf %8, %18 : vector<8x512xf32>
    %20 = arith.mulf %19, %19 : vector<8x512xf32>
    %cst_10 = arith.constant 0.00195694715 : f32
    %21 = vector.broadcast %cst_10 : f32 to vector<8x1xf32>
    %22 = arith.mulf %17, %21 : vector<8x1xf32>
    %cst_11 = arith.constant 9.99999974E-5 : f32
    %23 = vector.broadcast %cst_11 : f32 to vector<8x1xf32>
    %24 = arith.addf %22, %23 : vector<8x1xf32>
    %cst_12 = arith.constant 4.000000e+00 : f32
    %25 = vector.broadcast %cst_12 : f32 to vector<8x1xf32>
    %26 = arith.mulf %25, %24 : vector<8x1xf32>
    %27 = tpu.reciprocal %26 {approx = true} : vector<8x1xf32> -> vector<8x1xf32>
    %28 = vector.broadcast %27 : vector<8x1xf32> to vector<8x512xf32>
    %29 = arith.mulf %20, %28 : vector<8x512xf32>
    %cst_13 = arith.constant 5.000000e-01 : f32
    %30 = vector.broadcast %cst_13 : f32 to vector<8x512xf32>
    %31 = arith.addf %29, %30 : vector<8x512xf32>
    %32 = arith.negf %31 : vector<8x512xf32>
    %33 = math.exp %32 : vector<8x512xf32>
    %cst_14 = arith.constant 1.000000e+00 : f32
    %34 = vector.broadcast %cst_14 : f32 to vector<8x512xf32>
    %35 = arith.addf %34, %33 : vector<8x512xf32>
    %36 = arith.divf %34, %35 : vector<8x512xf32>
    %37 = arith.mulf %8, %36 : vector<8x512xf32>
    %c0_15 = arith.constant 0 : index
    %c0_16 = arith.constant 0 : index
    %c0_17 = arith.constant 0 : index
    %38 = vector.load %arg4[%c0_15, %c0_16, %c0_17] : memref<1x8x512xf32, #tpu.memory_space<vmem>>, vector<1x8x512xf32>
    %39 = vector.shape_cast %38 : vector<1x8x512xf32> to vector<8x512xf32>
    %40 = vector.shape_cast %37 : vector<8x512xf32> to vector<1x8x512xf32>
    tpu.vector_store %arg4[%c0_15, %c0_16, %c0_17], %40 {strides = array<i32>} : memref<1x8x512xf32, #tpu.memory_space<vmem>>, vector<1x8x512xf32>,
    return
  }
  func.func @transform_0(%arg0: i32) -> (i32, i32, i32) {
    %c0_i32 = arith.constant 0 : i32
    %c0_i32_0 = arith.constant 0 : i32
    %c0_i32_1 = arith.constant 0 : i32
    return %arg0, %c0_i32, %c0_i32_0 : i32, i32, i32
  }
  func.func @transform_1(%arg0: i32) -> (i32, i32) {
    %c0_i32 = arith.constant 0 : i32
    %c0_i32_0 = arith.constant 0 : i32
    %c0_i32_1 = arith.constant 0 : i32
    return %c0_i32, %c0_i32_0 : i32, i32
  }
  func.func @transform_2(%arg0: i32) -> (i32, i32) {
    %c0_i32 = arith.constant 0 : i32
    %c0_i32_0 = arith.constant 0 : i32
    %c0_i32_1 = arith.constant 0 : i32
    return %c0_i32, %c0_i32_0 : i32, i32
  }
  func.func @transform_3(%arg0: i32) -> (i32, i32, i32) {
    %c0_i32 = arith.constant 0 : i32
    %c0_i32_0 = arith.constant 0 : i32
    %c0_i32_1 = arith.constant 0 : i32
    return %arg0, %c0_i32, %c0_i32_0 : i32, i32, i32
  }
}

</mosaic_0001>

<bundles_post_ra>
// kernel: tpu_custom_call.1
= control target key start
LH: loop header
LB: loop body
LE: loop exit
PB: predicated region body
PF: predicated region fallthrough
CT: control target
= control target key end

     0   :  { %8 = vsyncpa [#allocation3], 0  ;;  %s978_s0 = inlined_call_operand.vmem [shape: bf16[2,108,512], index: 0, kind: input, shape index: {}]   ;;  %s979_s1 = inlined_call_operand.vmem [shape: bf16[8,108], index: 1, kind: input, shape index: {}]   ;;  %s980_s2 = inlined_call_operand.vmem [shape: f32[8,1], index: 2, kind: input, shape index: {}]   ;;  %s981_s3 = inlined_call_operand.hbm [shape: f32[2,8,512], index: 3, kind: output, shape index: {}]  }
   0x1   :  { %10 = vsyncpa [#allocation3 + $0x1], 0  ;;  %s821_s12 = smov 0   ;;  %s823_s13 = smov 0  }
   0x2   :  { %s825_s14 = smov 0   ;;  %s827_s15 = smov 0  }
   0x3 LB: > { %s842_s16 = sadd.s32 4294967295, %s797_s15   ;;  %s587_s17 = sadd.s32 4294967294, %s797_s15   ;;  %s797_s15 = sphi %s827_s15, %s987_s15   ;;  %s793_s14 = sphi %s825_s14, %s986_s14   ;;  %s789_s13 = sphi %s823_s13, %s985_s13   ;;  %s785_s12 = sphi %s821_s12, %s984_s12  }
   0x4   : > { %s846_s18 = sadd.s32 1, %s797_s15   ;;  %s91_s19 = sadd.s32 1, %s793_s14 }
   0x5   : > { %s88_s20 = ssub.s32 %s797_s15, %s846_s18  ;;  %p101_p0 = scmp.ne.s32.totalorder %s793_s14, %s789_s13 }
   0x6   : > { %p89_p1 = scmp.eq.s32.totalorder %s88_s20, 0  ;;  %p102_p2 = scmp.eq.s32.totalorder %s842_s16, 1 }
   0x7   : > { %p107_p3 = scmp.ne.s32.totalorder %s789_s13, %s785_s12  ;;  %p108_p4 = scmp.eq.s32.totalorder %s587_s17, 1 }
   0x8   : > { %s857_s21 = scalar_select %p89_p1, %s793_s14, %s91_s19  }
   0x9   : > { %p859_p5 = por %p102_p2, %p101_p0  ;;  %p863_p6 = por %p108_p4, %p107_p3 }
   0xa   : > { %p590_p7 = scmp.ge.s32.totalorder %s797_s15, 1  ;;  %p140_p8 = scmp.lt.s32.totalorder %s797_s15, 3 }
   0xc   : > { %p141_p9 = pnand %p590_p7, %p140_p8 }
   0xd   : > { %p164_p10 = scmp.lt.s32.totalorder (!%p141_p9), %s842_s16, 1  ;;  %s161_s6 = sand.u32 (!%p141_p9), 1, %s789_s13  }
   0xe   : > { %144 = sbr.rel (%p141_p9) target bundleno = 477 (0x1dd), region = 32  ;;  %s591_s7 = sshll.u32 (!%p141_p9), %s161_s6, 5 }
   0xf   : > { %s634_s8 = sshll.u32 (!%p141_p9), %s842_s16, 9  ;;  %s163_s9 = scalar_lea.vmem (!%p141_p9), [#allocation2], %s591_s7 }
  0x10   : > { %s528_s10 = sshll.u32 (!%p141_p9), %s163_s9, 4  ;;  %s943_s19 = scalar_lea.hbm (!%p141_p9), %s981_s3, %s634_s8  ;;  %s529_s10 = int_to_ptr.vmem [resolvable:$true] %s528_s10 }
  0x11   : > { %s737_s20 = scalar_lea.vmem (!%p141_p9), %s529_s10, 512  ;;  %s800_s24 = smov (!%p141_p9), [#allocation2]  }
  0x12   : > { %p738_p11 = scmp.ne.s32.totalorder (!%p141_p9), %s529_s10, %s737_s20  ;;  %s741_s25 = sshll.u32 (!%p141_p9), %s800_s24, 4  ;;  %s742_s25 = int_to_ptr.vmem [resolvable:$false] %s741_s25 }
  0x13   : > { %v799_v0 = vmov 0   ;;  %v199_v1 = vld [vmem:[%s980_s2] sm:$0xff]  ;;  %s165_s26 = scalar_select %p164_p10, %s842_s16, 1  ;;  %vm345_vm0 = vcmask 1045504   ;;  %vm341_vm1 = vcmask 883712  }
  0x14   : > { %390 = vmatprep.mubr.bf16.mxu0 %v799_v0  ;;  %431 = vmatprep.mubr.bf16.mxu1 %v799_v0  ;;  %v170_v32 = vld [vmem:[%s979_s1] sm:$0xf]  ;;  %s514_s16 = scalar_lea.sflag [#allocation3], %s161_s6  ;;  %p739_p12 = pnand %p738_p11, %p859_p5 }
  0x15   : > { %676 = vset.pattern.permute.xlu0 %v799_v0  ;;  %s635_s27 = smul.u32 224, %s165_s26  ;;  %s743_s26 = scalar_lea.vmem %s742_s25, 1024 }
  0x16   : > { %202 = vperm.xlu0 %676, %v199_v1   ;;  %p740_p13 = pneg %p739_p12  ;;  %p744_p0 = scmp.lt.s32.totalorder %s529_s10, %s742_s25 }
  0x17   : > { %s877_s30 = scalar_lea.vmem %s978_s0, %s635_s27  ;;  %p745_p1 = scmp.lt.s32.totalorder %s743_s26, %s737_s20 }
  0x18   : > { %v677_v2 = vld [vmem:[%s877_s30 + $0xc4] ss:$16 sps:$4 sm:$0x3f]   ;;  %v679_v3 = vld [vmem:[%s877_s30 + $0xcc] ss:$16 sps:$4 sm:$0x3f]  }
  0x19   : > { %621 = vmatprep.subr.msk.bf16.mxu0 %vm345_vm0, %v677_v2  ;;  %v681_v4 = vld [vmem:[%s877_s30 + $0xc0] ss:$16 sps:$4 sm:$0x3f]   ;;  %v682_v5 = vld [vmem:[%s877_s30 + $0xc8] ss:$16 sps:$4 sm:$0x3f]   ;;  %623 = vmatprep.subr.msk.bf16.mxu1 %vm345_vm0, %v679_v3  ;;  %p746_p2 = por %p745_p1, %p744_p0 }
  0x1a   : > { %v683_v6 = vld [vmem:[%s877_s30 + $0xa4] ss:$16 sps:$4 sm:$0xff]   ;;  %v347_v7 = vsel %vm345_vm0, %v681_v4, 0  ;;  %v353_v8 = vsel %vm345_vm0, %v682_v5, 0  ;;  %v685_v9 = vld [vmem:[%s877_s30 + $0xac] ss:$16 sps:$4 sm:$0xff]  }
  0x1b   : > { %361 = vmatpush1.bf16.msra.mxu0 %v347_v7  ;;  %402 = vmatpush1.bf16.msra.mxu1 %v353_v8  ;;  %v687_v10 = vld [vmem:[%s877_s30 + $0xa0] ss:$16 sps:$4 sm:$0xff]   ;;  %v688_v11 = vld [vmem:[%s877_s30 + $0xa8] ss:$16 sps:$4 sm:$0xff]   ;;  %v689_v12 = vld [vmem:[%s877_s30 + $0x84] ss:$16 sps:$4 sm:$0xff]   ;;  %p747_p3 = pnand %p746_p2, %p740_p13 }
  0x1c   : > { %362 = vmatprep.subr.bf16.mxu0 %v683_v6  ;;  %403 = vmatprep.subr.bf16.mxu1 %v685_v9  ;;  %v691_v13 = vld [vmem:[%s877_s30 + $0x8c] ss:$16 sps:$4 sm:$0xff]   ;;  %v693_v14 = vld [vmem:[%s877_s30 + $0x80] ss:$16 sps:$4 sm:$0xff]   ;;  %v694_v15 = vld [vmem:[%s877_s30 + $0x88] ss:$16 sps:$4 sm:$0xff]  }
  0x1d   : > { %v695_v16 = vld [vmem:[%s877_s30 + $0x64] ss:$16 sps:$4 sm:$0xff]   ;;  %v697_v17 = vld [vmem:[%s877_s30 + $0x6c] ss:$16 sps:$4 sm:$0xff]   ;;  %v699_v18 = vld [vmem:[%s877_s30 + $0x60] ss:$16 sps:$4 sm:$0xff]  }
  0x1e   : > { %v700_v19 = vld [vmem:[%s877_s30 + $0x68] ss:$16 sps:$4 sm:$0xff]   ;;  %v701_v20 = vld [vmem:[%s877_s30 + $0x44] ss:$16 sps:$4 sm:$0xff]   ;;  %v703_v21 = vld [vmem:[%s877_s30 + $0x4c] ss:$16 sps:$4 sm:$0xff]  }
  0x1f   : > { %363 = vmatpush1.bf16.msra.mxu0 %v687_v10  ;;  %404 = vmatpush1.bf16.msra.mxu1 %v688_v11  ;;  %v705_v22 = vld [vmem:[%s877_s30 + $0x40] ss:$16 sps:$4 sm:$0xff]   ;;  %v706_v23 = vld [vmem:[%s877_s30 + $0x48] ss:$16 sps:$4 sm:$0xff]   ;;  %v707_v24 = vld [vmem:[%s877_s30 + $0x24] ss:$16 sps:$4 sm:$0xff]  }
  0x20   : > { %364 = vmatprep.subr.bf16.mxu0 %v689_v12  ;;  %405 = vmatprep.subr.bf16.mxu1 %v691_v13  ;;  %v709_v25 = vld [vmem:[%s877_s30 + $0x2c] ss:$16 sps:$4 sm:$0xff]   ;;  %v711_v26 = vld [vmem:[%s877_s30 + $0x20] ss:$16 sps:$4 sm:$0xff]   ;;  %v712_v27 = vld [vmem:[%s877_s30 + $0x28] ss:$16 sps:$4 sm:$0xff]  }
  0x21   : > { %v713_v28 = vld [vmem:[%s877_s30 + $0x4] ss:$16 sps:$4 sm:$0xff]   ;;  %v715_v29 = vld [vmem:[%s877_s30 + $0xc] ss:$16 sps:$4 sm:$0xff]   ;;  %v717_v30 = vld [vmem:[%s877_s30] ss:$16 sps:$4 sm:$0xff]  }
  0x22   : > { %v718_v31 = vld [vmem:[%s877_s30 + $0x8] ss:$16 sps:$4 sm:$0xff]  }
  0x23   : > { %365 = vmatpush1.bf16.msra.mxu0 %v693_v14  ;;  %406 = vmatpush1.bf16.msra.mxu1 %v694_v15 }
  0x24   : > { %366 = vmatprep.subr.bf16.mxu0 %v695_v16  ;;  %407 = vmatprep.subr.bf16.mxu1 %v697_v17 }
  0x27   : > { %367 = vmatpush1.bf16.msra.mxu0 %v699_v18  ;;  %408 = vmatpush1.bf16.msra.mxu1 %v700_v19 }
  0x28   : > { %368 = vmatprep.subr.bf16.mxu0 %v701_v20  ;;  %409 = vmatprep.subr.bf16.mxu1 %v703_v21 }
  0x2b   : > { %369 = vmatpush1.bf16.msra.mxu0 %v705_v22  ;;  %410 = vmatpush1.bf16.msra.mxu1 %v706_v23 }
  0x2c   : > { %370 = vmatprep.subr.bf16.mxu0 %v707_v24  ;;  %411 = vmatprep.subr.bf16.mxu1 %v709_v25 }
  0x2f   : > { %371 = vmatpush1.bf16.msra.mxu0 %v711_v26  ;;  %412 = vmatpush1.bf16.msra.mxu1 %v712_v27 }
  0x30   : > { %372 = vmatprep.subr.bf16.mxu0 %v713_v28  ;;  %413 = vmatprep.subr.bf16.mxu1 %v715_v29 }
  0x33   : > { %373 = vmatpush1.bf16.msra.mxu0 %v717_v30  ;;  %414 = vmatpush1.bf16.msra.mxu1 %v718_v31 }
  0x36   : > { %622 = vmatmul.mubr.msk.bf16.vlgmr.msra.gmra.mxu0 %vm341_vm1, %v170_v32  ;;  %624 = vmatmul.mubr.msk.bf16.vlgmr.msra.gmra.mxu1 %vm341_vm1, %v170_v32 }
  0x91   : > { %v203_v33 = vpop.permute.xlu0 %202 }
  0xf6   : > { %v392_v34 = vpop.f32.mrf.mxu0  ;;  %v433_v35 = vpop.f32.mrf.mxu1 }
  0xf7   : > { %v393_v36 = vadd.f32 %v392_v34, %v203_v33  ;;  %v434_v37 = vadd.f32 %v433_v35, %v203_v33 }
  0xf8   : > { %v394_v38 = vpop.f32.mrf.mxu0  ;;  %v435_v39 = vpop.f32.mrf.mxu1 }
  0xf9   : > { %v910_v40 = vmax.f32 %v393_v36, 0.0  ;;  %v395_v41 = vadd.f32 %v394_v38, %v203_v33  ;;  %v436_v42 = vadd.f32 %v435_v39, %v203_v33  ;;  %v912_v45 = vmax.f32 %v434_v37, 0.0 }
  0xfa   : > { %v396_v43 = vpop.f32.mrf.mxu0  ;;  %v437_v44 = vpop.f32.mrf.mxu1 }
  0xfb   : > { %v914_v46 = vmax.f32 %v395_v41, 0.0  ;;  %v916_v49 = vmax.f32 %v436_v42, 0.0  ;;  %v449_v51 = vmul.f32 %v910_v40, %v910_v40  ;;  %v451_v54 = vmul.f32 %v912_v45, %v912_v45 }
  0xfc   : > { %v397_v47 = vpop.f32.mrf.mxu0  ;;  %v438_v48 = vpop.f32.mrf.mxu1 }
  0xfd   : > { %v444_v50 = vadd.f32 %v914_v46, %v910_v40  ;;  %v450_v52 = vmul.f32 %v914_v46, %v914_v46  ;;  %v452_v57 = vmul.f32 %v916_v49, %v916_v49 }
  0xff   : > { %v445_v53 = vadd.f32 %v444_v50, %v912_v45  ;;  %v453_v55 = vadd.f32 %v450_v52, %v449_v51 }
 0x101   : > { %v446_v56 = vadd.f32 %v445_v53, %v916_v49  ;;  %v454_v58 = vadd.f32 %v453_v55, %v451_v54 }
 0x103   : > { %447 = vadd.xlane.f32.xlu0 %v446_v56  ;;  %v455_v59 = vadd.f32 %v454_v58, %v452_v57 }
 0x105   : > { %456 = vadd.xlane.f32.xlu1 %v455_v59 }
 0x18c   : > { %v448_v60 = vpop.xlane.xlu0 %447 }
 0x18d   : > { %v458_v61 = vmul.f32 0.001953125, %v448_v60 }
 0x18e   : > { %v457_v63 = vpop.xlane.xlu1 %456 }
 0x18f   : > { %v459_v62 = vmul.f32 %v458_v61, %v448_v60  ;;  %v461_v4 = vsub.f32 %v910_v40, %v458_v61  ;;  %v462_v5 = vsub.f32 %v914_v46, %v458_v61  ;;  %v463_v6 = vsub.f32 %v912_v45, %v458_v61 }
 0x190   : > { %v464_v7 = vsub.f32 %v916_v49, %v458_v61 }
 0x191   : > { %v460_v0 = vsub.f32 %v457_v63, %v459_v62  ;;  %v465_v8 = vmul.f32 %v461_v4, %v461_v4  ;;  %v466_v9 = vmul.f32 %v462_v5, %v462_v5  ;;  %v467_v10 = vmul.f32 %v463_v6, %v463_v6 }
 0x192   : > { %v468_v11 = vmul.f32 %v464_v7, %v464_v7 }
 0x193   : > { %v469_v1 = vmul.f32 0.0019569471, %v460_v0 }
 0x195   : > { %v470_v2 = vadd.f32 0.0001, %v469_v1 }
 0x197   : > { %v471_v3 = vmul.f32 4.0, %v470_v2 }
 0x199   : > { %719 = vrcp.f32 %v471_v3 }
 0x1a6   : > { %v720_v12 = vpop.eup %719 }
 0x1a7   : > { %v473_v13 = vmul.f32 %v720_v12, %v465_v8  ;;  %v474_v14 = vmul.f32 %v720_v12, %v466_v9  ;;  %v475_v15 = vmul.f32 %v720_v12, %v467_v10  ;;  %v476_v16 = vmul.f32 %v720_v12, %v468_v11 }
 0x1a9   : > { %v477_v17 = vadd.f32 0.5, %v473_v13  ;;  %v478_v18 = vadd.f32 0.5, %v474_v14  ;;  %v479_v19 = vadd.f32 0.5, %v475_v15  ;;  %v480_v20 = vadd.f32 0.5, %v476_v16 }
 0x1ab   : > { %v625_v21 = vmul.f32 -1.442695, %v477_v17  ;;  %v626_v22 = vmul.f32 -1.442695, %v478_v18  ;;  %v627_v23 = vmul.f32 -1.442695, %v479_v19 }
 0x1ac   : > { %v628_v24 = vmul.f32 -1.442695, %v480_v20 }
 0x1ad   : > { %721 = vpow2.f32 %v625_v21 }
 0x1ae   : > { %723 = vpow2.f32 %v626_v22 }
 0x1af   : > { %725 = vpow2.f32 %v627_v23 }
 0x1b0   : > { %727 = vpow2.f32 %v628_v24 }
 0x1ba   : > { %v722_v25 = vpop.eup %721 }
 0x1bb   : > { %v724_v26 = vpop.eup %723  ;;  %v493_v27 = vadd.f32 1.0, %v722_v25 }
 0x1bc   : > { %v726_v28 = vpop.eup %725  ;;  %v494_v29 = vadd.f32 1.0, %v724_v26 }
 0x1bd   : > { %v728_v30 = vpop.eup %727  ;;  %v495_v31 = vadd.f32 1.0, %v726_v28  ;;  %729 = vrcp.f32 %v493_v27 }
 0x1be   : > { %v496_v32 = vadd.f32 1.0, %v728_v30  ;;  %731 = vrcp.f32 %v494_v29 }
 0x1bf   : > { %733 = vrcp.f32 %v495_v31 }
 0x1c0   : > { %735 = vrcp.f32 %v496_v32 }
 0x1ca   : > { %v730_v33 = vpop.eup %729 }
 0x1cb   : > { %v732_v34 = vpop.eup %731  ;;  %v505_v35 = vmul.f32 %v730_v33, %v910_v40 }
 0x1cc   : > { %v734_v36 = vpop.eup %733  ;;  %v506_v37 = vmul.f32 %v732_v34, %v914_v46 }
 0x1cd   : > { %v736_v38 = vpop.eup %735  ;;  %v507_v39 = vmul.f32 %v734_v36, %v912_v45  ;;  %509 = vst [vmem:[%s163_s9] sm:$0xff] %v505_v35 }
 0x1ce   : > { %v508_v41 = vmul.f32 %v736_v38, %v916_v49  ;;  %510 = vst [vmem:[%s163_s9 + $0x8] sm:$0xff] %v506_v37 }
 0x1cf   : > { %511 = vst [vmem:[%s163_s9 + $0x10] sm:$0xff] %v507_v39 }
 0x1d0   : > { %512 = vst [vmem:[%s163_s9 + $0x18] sm:$0xff] %v508_v41 }
 0x1d1   : > { %750 = shalt.err (!%p747_p3)
}
 0x1d2   : > { %s751_s27 = scalar_lea.hbm %s943_s19, 512  ;;  %s755_s30 = scalar_lea.hbm %s981_s3, 1024 }
 0x1d3   : > { %p752_p4 = scmp.ne.s32.totalorder %s943_s19, %s751_s27  ;;  %p756_p9 = scmp.lt.s32.totalorder %s943_s19, %s981_s3 }
 0x1d4   : > { %p757_p10 = scmp.lt.s32.totalorder %s755_s30, %s751_s27 }
 0x1d5   : > { %p753_p7 = pnand %p752_p4, %p859_p5 }
 0x1d6   : > { %p758_p11 = por %p757_p10, %p756_p9 }
 0x1d7   : > { %p754_p8 = pneg %p753_p7 }
 0x1d9   : > { %p759_p12 = pnand %p758_p11, %p754_p8 }
 0x1db   : > { %762 = shalt.err (!%p759_p12)
}
 0x1dc   : > { %636 = dma.vmem_to_hbm [thread:$0]  (%p859_p5), %s529_s10, 512, %s943_s19, %s514_s16  }
 0x1dd PF: > { %p642_p13 = scmp.ge.s32.totalorder %s797_s15, 2  ;;  %s540_s6 = sand.u32 1, %s785_s12  }
 0x1de   : > { %s541_s7 = scalar_lea.sflag [#allocation3], %s540_s6 }
 0x1df   : > { %p639_p0 = pnand %p642_p13, %p863_p6 }
 0x1e1   : > { %p640_p1 = pneg %p639_p0 }
 0x1e3   : > { %780 = dma.done.wait (%p640_p1), %s541_s7, 512  }
 0x1e4   : > { %782 = vsyncadd (%p640_p1), %s541_s7, 4294966784  ;;  %p13_p2 = scmp.ge.s32.totalorder %s846_s18, 4   ;;  %s984_s12 = smov %s789_s13 }
 0x1e5   : > { %s985_s13 = smov %s793_s14  ;;  %s986_s14 = smov %s857_s21 }
 0x1e6   : > { %s987_s15 = smov %s846_s18  ;;  %15 = sbr.rel (!%p13_p2) target bundleno = 3 (0x3), region = 67 }
 0x1eb   :  { %546 = vsyncpa [#allocation3], 1 }
 0x1ec   :  { %548 = vsyncpa [#allocation3 + $0x1], 1 }

</bundles_post_ra>
